<compile_context>
chip_gen: v7x
topology: tpu7x:2x2x1
jax: 0.10.0
libtpu: 0.0.40
codegen_flags: <defaults>
</compile_context>

<pallas_src>
import jax
import jax.numpy as jnp
from jax.experimental import pallas as pl
from jax.experimental.pallas import tpu as pltpu


def _round_up(v, m):
    return (v + m - 1) // m * m


def _pick_tile(target, total):
    """Largest multiple of 128 that is <= target and divides `total` (a 128-multiple)."""
    assert total % 128 == 0 and total >= 128, total
    target = max(128, min(int(target), total))   # clamp: avoid the <128 -> 0 footgun
    t = (target // 128) * 128
    while total % t:
        t -= 128
    return t


def _graph_conv_kernel(e_ref, xw_ref, b_ref, o_ref):
    # grid = (output-row tiles ["parallel"], contraction tiles ["arbitrary"]).
    @pl.when(pl.program_id(1) == 0)
    def _init():
        # Seed the resident f32 output tile with the bias (added exactly once).
        o_ref[...] = jnp.broadcast_to(b_ref[...], o_ref.shape)

    # Edges arrive as int8 (binary adjacency) or bf16 (weighted); either way the
    # MXU operands are bf16 with f32 accumulation.  The int8->bf16 upcast is VPU
    # work that hides under the edge DMA.
    e = e_ref[...].astype(jnp.bfloat16)
    # Single long contraction covering all T edge types at once.
    o_ref[...] += jnp.dot(e, xw_ref[...], preferred_element_type=jnp.float32)


def graph_conv(x, edges, weight, bias, *, tile_m=512, tile_k=512, binary_edges=True):
    """
    x:      (1, N, F_in)  float32
    edges:  (T, N, N)     float32  (T == num_edge_style)
    weight: (T, F_in, F_out)
    bias:   (F_out,)
    returns (1, N, F_out) float32
    """
    T, N, _ = edges.shape
    F_in = x.shape[-1]
    F_out = weight.shape[-1]

    # Pad to TPU-friendly shapes: lane dims multiples of 128 (lane-dense output
    # stores / full MXU tiles), node dim a multiple of 128 so every tile obeys
    # the (8,128) (and int8 (32,128)) layout rules.
    n_pad = _round_up(max(N, 1), 128)
    fo = _round_up(F_out, 128)
    kt = T * n_pad                      # total contraction length (all types concatenated)

    tm = _pick_tile(tile_m, n_pad)      # output-row tile
    tck = _pick_tile(tile_k, kt)        # contraction tile (multiple of 128; defaults are 256-aligned)

    # v7x megacore: keep >= 2 tiles on the "parallel" axis so both TensorCores
    # get work.  n_pad//2 is always a multiple of 64, so layout rules still hold.
    if n_pad // tm < 2:
        tm = n_pad // 2

    e_store = jnp.int8 if binary_edges else jnp.bfloat16

    # --- HBM-side prep (single fused pass per tensor) -----------------------
    # e_cat[i, t*n_pad + n] = edges[t, n, i]  (per-type transposed adjacency,
    # concatenated along the contraction/lane axis).
    e_cat = jnp.pad(
        jnp.transpose(edges, (2, 0, 1)).astype(e_store),
        ((0, n_pad - N), (0, 0), (0, n_pad - N)),
    ).reshape(n_pad, kt)

    # Hoisted inner product xw[t] = x @ W[t], stacked along the contraction axis
    # so the kernel needs only one dot per grid step.
    xw = jnp.einsum("nf,tfo->tno", x.reshape(N, F_in), weight)           # f32
    xw_cat = jnp.pad(
        xw.astype(jnp.bfloat16),
        ((0, 0), (0, n_pad - N), (0, fo - F_out)),
    ).reshape(kt, fo)

    b_p = jnp.zeros((1, fo), jnp.float32).at[0, :F_out].set(bias.astype(jnp.float32))

    grid = (n_pad // tm, kt // tck)

    out = pl.pallas_call(
        _graph_conv_kernel,
        out_shape=jax.ShapeDtypeStruct((n_pad, fo), jnp.float32),
        grid_spec=pltpu.PrefetchScalarGridSpec(
            num_scalar_prefetch=0,
            grid=grid,
            in_specs=[
                pl.BlockSpec((tm, tck), lambda i, k: (i, k)),   # edges^T tile (concat over T)
                pl.BlockSpec((tck, fo), lambda i, k: (k, 0)),   # (x @ W) tile (concat over T)
                pl.BlockSpec((1, fo), lambda i, k: (0, 0)),     # bias (resident)
            ],
            out_specs=pl.BlockSpec((tm, fo), lambda i, k: (i, 0)),  # in-place f32 accumulator
        ),
        compiler_params=pltpu.CompilerParams(
            dimension_semantics=("parallel", "arbitrary"),
        ),
    )(e_cat, xw_cat, b_p)

    return out[:N, :F_out].reshape(1, N, F_out)


def _reference(x, edges, weight, bias):
    # Pure-JAX f32 reference mirroring the PyTorch code path.
    activation = jnp.einsum("tmn,bmf->tnf", edges, x)     # edges.transpose(1,2) @ input
    conv = jnp.einsum("tnf,tfo->no", activation, weight)  # sum over t of bmm
    return (conv + bias)[None, :, :]


if __name__ == "__main__":
    # Small shapes: num_edge_style T=3, N=16 nodes, input_size=32, output_size=32
    T, N, F_in, F_out = 3, 16, 32, 32

    key = jax.random.PRNGKey(0)
    k_x, k_e, k_w, k_b = jax.random.split(key, 4)

    # Deterministic parameter init mimicking init_parameters():
    #   stdv = 1 / sqrt(num_edge_style * output_size); uniform(-stdv, stdv)
    stdv = 1.0 / (T * F_out) ** 0.5
    weight = jax.random.uniform(k_w, (T, F_in, F_out), jnp.float32, -stdv, stdv)
    bias = jax.random.uniform(k_b, (F_out,), jnp.float32, -stdv, stdv)

    x = jax.random.normal(k_x, (1, N, F_in), jnp.float32)
    edges = (jax.random.uniform(k_e, (T, N, N), jnp.float32) > 0.7).astype(jnp.float32)

    out = jax.block_until_ready(graph_conv(x, edges, weight, bias))
    assert out.shape == (1, N, F_out)

    # Reference mirroring the kernel's numerics (xw rounded to bf16, f32 accumulation,
    # edges 0/1 so exact in int8/bf16).
    xw_ref = jnp.einsum("nf,tfo->tno", x.reshape(N, F_in), weight)
    xw_b = xw_ref.astype(jnp.bfloat16).astype(jnp.float32)
    ref_bf16 = (jnp.einsum("tni,tno->io", edges, xw_b) + bias)[None]

    # Full-f32 module reference (looser tolerance covers the bf16 rounding).
    ref_f32 = _reference(x, edges, weight, bias)

    assert jnp.allclose(out, ref_bf16, atol=1e-2, rtol=1e-2), float(
        jnp.max(jnp.abs(out - ref_bf16)))
    assert jnp.allclose(out, ref_f32, atol=5e-2, rtol=5e-2), float(
        jnp.max(jnp.abs(out - ref_f32)))

    print("KERNEL_OK")
</pallas_src>

<mosaic_0001>
module attributes {stable_mosaic.version = 11 : i64} {
  func.func @_graph_conv_kernel(%arg0: i32, %arg1: i32, %arg2: memref<64x384xi8, #tpu.memory_space<vmem>>, %arg3: memref<384x128xbf16, #tpu.memory_space<vmem>>, %arg4: memref<1x128xf32, #tpu.memory_space<vmem>>, %arg5: memref<64x128xf32, #tpu.memory_space<vmem>>) attributes {dimension_semantics = [#tpu.dimension_semantics<parallel>, #tpu.dimension_semantics<arbitrary>], iteration_bounds = array<i64: 2, 1>, scalar_prefetch = 0 : i64, scratch_operands = 0 : i64, tpu.core_type = #tpu.core_type<tc>, window_params = [{transform_indices = @transform_0, window_bounds = array<i64: 64, 384>}, {transform_indices = @transform_1, window_bounds = array<i64: 384, 128>}, {pipeline_mode = #tpu.pipeline_mode<synchronous>, transform_indices = @transform_2, window_bounds = array<i64: 1, 128>}, {transform_indices = @transform_3, window_bounds = array<i64: 64, 128>}]} {
    %c0_i32 = arith.constant 0 : i32
    %0 = arith.cmpi eq, %arg1, %c0_i32 : i32
    %1 = arith.extui %0 : i1 to i32
    %c0_i32_0 = arith.constant 0 : i32
    %2 = arith.cmpi ne, %1, %c0_i32_0 : i32
    scf.if %2 {
      %c0_8 = arith.constant 0 : index
      %c0_9 = arith.constant 0 : index
      %10 = vector.load %arg4[%c0_8, %c0_9] : memref<1x128xf32, #tpu.memory_space<vmem>>, vector<1x128xf32>
      %11 = vector.shape_cast %10 : vector<1x128xf32> to vector<1x128xf32>
      %12 = vector.broadcast %11 : vector<1x128xf32> to vector<64x128xf32>
      %c0_10 = arith.constant 0 : index
      %c0_11 = arith.constant 0 : index
      %13 = vector.load %arg5[%c0_10, %c0_11] : memref<64x128xf32, #tpu.memory_space<vmem>>, vector<64x128xf32>
      tpu.vector_store %arg5[%c0_10, %c0_11], %12 {strides = array<i32>} : memref<64x128xf32, #tpu.memory_space<vmem>>, vector<64x128xf32>,
    } else {
    }
    %c0 = arith.constant 0 : index
    %c0_1 = arith.constant 0 : index
    %3 = vector.load %arg2[%c0, %c0_1] : memref<64x384xi8, #tpu.memory_space<vmem>>, vector<64x384xi8>
    %4 = arith.sitofp %3 : vector<64x384xi8> to vector<64x384xbf16>
    %c0_2 = arith.constant 0 : index
    %c0_3 = arith.constant 0 : index
    %5 = vector.load %arg5[%c0_2, %c0_3] : memref<64x128xf32, #tpu.memory_space<vmem>>, vector<64x128xf32>
    %c0_4 = arith.constant 0 : index
    %c0_5 = arith.constant 0 : index
    %6 = vector.load %arg3[%c0_4, %c0_5] : memref<384x128xbf16, #tpu.memory_space<vmem>>, vector<384x128xbf16>
    %cst = arith.constant dense<0.000000e+00> : vector<64x128xf32>
    %7 = tpu.matmul %4, %6, %cst {dimension_numbers = #tpu.dot_dimension_numbers<[1], [0], [0], [1], [0, 0, 1, 1], [], []>} : vector<64x384xbf16>, vector<384x128xbf16>, vector<64x128xf32> -> vector<64x128xf32>
    %8 = arith.addf %5, %7 : vector<64x128xf32>
    %c0_6 = arith.constant 0 : index
    %c0_7 = arith.constant 0 : index
    %9 = vector.load %arg5[%c0_6, %c0_7] : memref<64x128xf32, #tpu.memory_space<vmem>>, vector<64x128xf32>
    tpu.vector_store %arg5[%c0_6, %c0_7], %8 {strides = array<i32>} : memref<64x128xf32, #tpu.memory_space<vmem>>, vector<64x128xf32>,
    return
  }
  func.func @transform_0(%arg0: i32, %arg1: i32) -> (i32, i32) {
    %c0_i32 = arith.constant 0 : i32
    return %arg0, %arg1 : i32, i32
  }
  func.func @transform_1(%arg0: i32, %arg1: i32) -> (i32, i32) {
    %c0_i32 = arith.constant 0 : i32
    %c0_i32_0 = arith.constant 0 : i32
    return %arg1, %c0_i32 : i32, i32
  }
  func.func @transform_2(%arg0: i32, %arg1: i32) -> (i32, i32) {
    %c0_i32 = arith.constant 0 : i32
    %c0_i32_0 = arith.constant 0 : i32
    %c0_i32_1 = arith.constant 0 : i32
    return %c0_i32, %c0_i32_0 : i32, i32
  }
  func.func @transform_3(%arg0: i32, %arg1: i32) -> (i32, i32) {
    %c0_i32 = arith.constant 0 : i32
    %c0_i32_0 = arith.constant 0 : i32
    return %arg0, %c0_i32 : i32, i32
  }
}

</mosaic_0001>

<bundles_post_ra>
// kernel: tpu_custom_call.1
= control target key start
LH: loop header
LB: loop body
LE: loop exit
PB: predicated region body
PF: predicated region fallthrough
CT: control target
= control target key end

     0   :  { %8 = vsyncpa [#allocation3], 0  ;;  %s1362_s0 = inlined_call_operand.hbm [shape: s8[128,384], index: 0, kind: input, shape index: {}]   ;;  %s1363_s1 = inlined_call_operand.hbm [shape: bf16[384,128], index: 1, kind: input, shape index: {}]   ;;  %s1364_s2 = inlined_call_operand.vmem [shape: f32[1,128], index: 2, kind: input, shape index: {}]   ;;  %s1365_s3 = inlined_call_operand.hbm [shape: f32[128,128], index: 3, kind: output, shape index: {}]  }
   0x1   :  { %10 = vsyncpa [#allocation3 + $0x1], 0 }
   0x2   :  { %11 = vsyncpa [#allocation6], 0 }
   0x3   :  { %12 = vsyncpa [#allocation4], 0 }
   0x4   :  { %14 = vsyncpa [#allocation4 + $0x1], 0  ;;  %s1126_s12 = smov 0   ;;  %s1128_s13 = smov 0  }
   0x5   :  { %s1130_s14 = smov 0   ;;  %s1132_s15 = smov 0  }
   0x6   :  { %s1134_s16 = smov 0   ;;  %s1136_s17 = smov 0  }
   0x7 LB: > { %s727_s18 = sadd.s32 4294967295, %s1095_s17   ;;  %s728_s19 = sadd.s32 4294967294, %s1095_s17   ;;  %s1095_s17 = sphi %s1136_s17, %s20_s17   ;;  %s1091_s16 = sphi %s1134_s16, %s1388_s16   ;;  %s1087_s15 = sphi %s1132_s15, %s1387_s15   ;;  %s1083_s14 = sphi %s1130_s14, %s1386_s14   ;;  %s1079_s13 = sphi %s1128_s13, %s1385_s13   ;;  %s1075_s12 = sphi %s1126_s12, %s1384_s12  }
   0x8   : > { %p54_p0 = scmp.ne.s32.totalorder %s1079_s13, %s1075_s12  ;;  %p1160_p1 = scmp.eq.s32.totalorder %s727_s18, 0 }
   0x9   : > { %p1164_p2 = scmp.eq.s32.totalorder %s727_s18, 1  ;;  %p131_p3 = scmp.eq.s32.totalorder %s728_s19, 1 }
   0xa   : > { %s1370_s20 = scalar_select %p1160_p1, 1, 0 }
   0xb   : > { %s1371_s21 = scalar_select %p1164_p2, 1, 0 }
   0xc   : > { %p1170_p4 = por %p1160_p1, %p54_p0  ;;  %p729_p5 = scmp.ge.s32.totalorder %s1095_s17, 1 }
   0xd   : > { %p1175_p6 = por %p131_p3, %p54_p0  ;;  %p138_p7 = scmp.lt.s32.totalorder %s1095_s17, 3 }
   0xe   : > { %s1372_s22 = scalar_select %p1170_p4, 1, 0 }
   0xf   : > { %s1373_s23 = scalar_select %p1175_p6, 1, 0 }
  0x10   : > { %p1180_p8 = pnand %p729_p5, %p138_p7  ;;  %s1097_s25 = smov [#allocation5]  }
  0x11   : > { %s153_s26 = sshll.u32 %s1097_s25, 4  ;;  %s32_s28 = sadd.s32 1, %s1091_s16  ;;  %s154_s26 = int_to_ptr.vmem [resolvable:$true] %s153_s26 }
  0x12   : > { %s1374_s24 = scalar_select %p1180_p8, 1, 0 }
  0x13   : > { %p856_p9 = pneg %p1180_p8  ;;  %s951_s4 = scalar_lea.hbm %s1363_s1, 3072 }
  0x14   : > { %p952_p12 = scmp.ne.s32.totalorder %s1363_s1, %s951_s4  ;;  %p958_p5 = scmp.lt.u32.totalorder %s951_s4, %s1363_s1 }
  0x15   : > { %p1189_p11 = pnand %p856_p9, %p1160_p1 }
  0x17   : > { %p953_p13 = pneg %p1189_p11 }
  0x19   : > { %p954_p0 = pnand %p953_p13, %p952_p12 }
  0x1b   : > { %p955_p3 = pneg %p954_p0 }
  0x1d   : > { %p960_p7 = pnand %p958_p5, %p955_p3 }
  0x1f   : > { %963 = shalt.err (!%p960_p7)
}
  0x20   : > { %s964_s9 = scalar_lea.vmem %s154_s26, 3072  ;;  %p972_p1 = scmp.lt.s32.totalorder %s154_s26, %s154_s26 }
  0x21   : > { %p965_p9 = scmp.ne.s32.totalorder %s154_s26, %s964_s9  ;;  %p973_p4 = scmp.lt.s32.totalorder %s964_s9, %s964_s9 }
  0x23   : > { %p967_p10 = pnand %p965_p9, %p953_p13  ;;  %p974_p8 = por %p973_p4, %p972_p1 }
  0x25   : > { %p968_p6 = pneg %p967_p10 }
  0x27   : > { %p975_p2 = pnand %p974_p8, %p968_p6 }
  0x29   : > { %978 = shalt.err (!%p975_p2)
}
  0x2a   : > { %s1098_s10 = smov 64   ;;  %s1099_s11 = smov 4  }
  0x2b   : > { %859 = dma.hbm_to_vmem [thread:$0]  (!%p1189_p11), %s1363_s1, 3072, %s154_s26, [#allocation6], %s1098_s10, %s1098_s10, %s1099_s11  }
  0x2c   : > { %p34_p1 = scmp.ge.s32.totalorder %s32_s28, 2  ;;  %s41_s25 = sadd.s32 1, %s1083_s14 }
  0x2d   : > { %p48_p2 = scmp.ne.s32.totalorder %s1083_s14, %s1079_s13  ;;  %p49_p4 = scmp.eq.s32.totalorder %s1095_s17, 0 }
  0x2e   : > { %s1390_s28 = smov (%p34_p1, %s32_s28), 0  ;;  %p1376_p8 = scmp.ne.s32.totalorder %s1371_s21, 0 }
  0x2f   : > { %p50_p6 = por %p49_p4, %p48_p2  ;;  %s36_s30 = ssub.s32 %s1091_s16, %s1390_s28 }
  0x30   : > { %p1218_p10 = por %p1376_p8, %p48_p2  ;;  %p869_p12 = scmp.lt.s32.totalorder %s1095_s17, 2 }
  0x31   : > { %p39_p13 = scmp.eq.s32.totalorder %s36_s30, 0  ;;  %s170_s27 = sand.u32 1, %s1083_s14  }
  0x32   : > { %s845_s4 = smul.u32 48, %s170_s27  ;;  %p1230_p11 = pnand %p869_p12, %p50_p6 }
  0x33   : > { %s1227_s5 = scalar_select %p39_p13, %s1083_s14, %s41_s25  }
  0x34   : > { %s846_s26 = smul.u32 768, %s1091_s16  ;;  %s174_s6 = scalar_lea.vmem [#allocation2], %s845_s4 }
  0x35   : > { %s184_s7 = sshll.u32 %s174_s6, 4  ;;  %s1241_s11 = scalar_lea.sflag [#allocation3], %s170_s27  ;;  %s1239_s7 = int_to_ptr.vmem [resolvable:$true] %s184_s7 }
  0x36   : > { %s1237_s10 = scalar_lea.hbm %s1362_s0, %s846_s26  ;;  %p981_p3 = pneg %p1230_p11 }
  0x37   : > { %s979_s18 = scalar_lea.hbm %s1237_s10, 768  ;;  %s984_s30 = scalar_lea.hbm %s1362_s0, 1536 }
  0x38   : > { %p980_p0 = scmp.ne.s32.totalorder %s1237_s10, %s979_s18  ;;  %p985_p9 = scmp.lt.u32.totalorder %s1237_s10, %s1362_s0 }
  0x39   : > { %p986_p1 = scmp.lt.u32.totalorder %s984_s30, %s979_s18  ;;  %p988_p4 = scmp.lt.u32.totalorder %s979_s18, %s1237_s10 }
  0x3a   : > { %p982_p5 = pnand %p981_p3, %p980_p0 }
  0x3b   : > { %p987_p2 = por %p986_p1, %p985_p9 }
  0x3c   : > { %p983_p7 = pneg %p982_p5 }
  0x3d   : > { %p989_p6 = por %p988_p4, %p987_p2 }
  0x3f   : > { %p990_p8 = pnand %p989_p6, %p983_p7 }
  0x41   : > { %993 = shalt.err (!%p990_p8)
}
  0x42   : > { %s994_s27 = scalar_lea.vmem %s1239_s7, 768  ;;  %s1100_s6 = smov [#allocation2]  }
  0x43   : > { %p995_p12 = scmp.ne.s32.totalorder %s1239_s7, %s994_s27  ;;  %s999_s9 = sshll.u32 %s1100_s6, 4  ;;  %s1000_s9 = int_to_ptr.vmem [resolvable:$false] %s999_s9 }
  0x44   : > { %s1001_s21 = scalar_lea.vmem %s1000_s9, 1536  ;;  %p1002_p5 = scmp.lt.s32.totalorder %s1239_s7, %s1000_s9 }
  0x45   : > { %p997_p13 = pnand %p995_p12, %p981_p3  ;;  %p1003_p9 = scmp.lt.s32.totalorder %s1001_s21, %s994_s27 }
  0x47   : > { %p998_p0 = pneg %p997_p13  ;;  %p1004_p1 = por %p1003_p9, %p1002_p5 }
  0x49   : > { %p1005_p2 = pnand %p1004_p1, %p998_p0 }
  0x4b   : > { %1008 = shalt.err (!%p1005_p2)
}
  0x4c   : > { %s1101_s18 = smov 384   ;;  %s1102_s19 = smov 24  }
  0x4d   : > { %863 = dma.hbm_to_vmem [thread:$0]  (!%p1230_p11), %s1237_s10, 768, %s1239_s7, %s1241_s11, %s1101_s18, %s1101_s18, %s1102_s19  }
  0x4e   : > { %p1379_p3 = scmp.ne.s32.totalorder %s1374_s24, 0 }
  0x4f   : > { %s1272_s25 = sand.u32 (!%p1379_p3), 1, %s1079_s13   ;;  %p1380_p7 = scmp.ne.s32.totalorder (!%p1379_p3), %s1372_s22, 0 }
  0x50   : > { %196 = sbr.rel (%p1379_p3) target bundleno = 384 (0x180), region = 32  ;;  %s199_s4 = scalar_lea.sflag (!%p1379_p3), [#allocation3], %s1272_s25 }
  0x51   : > { %s847_s30 = smul.u32 (!%p1379_p3), 48, %s1272_s25 }
  0x53   : > { %s1276_s26 = scalar_lea.vmem (!%p1379_p3), [#allocation2], %s847_s30 }
  0x57   : > { %1062 = dma.done.wait (%p1380_p7), %s199_s4, 768  }
  0x58   : > { %1064 = vsyncadd (%p1380_p7), %s199_s4, 4294966528  ;;  %p1381_p11 = scmp.ne.s32.totalorder %s1370_s20, 0 }
  0x5a   : > { %1066 = dma.done.wait (%p1381_p11), [#allocation6], 3072  }
  0x5b   : > { %1068 = vsyncadd (%p1381_p11), [#allocation6], 4294964224  ;;  %v927_v0 = vld [vmem:[#allocation5 + $0x40] sm:$0xff]   ;;  %v930_v3 = vld [vmem:[#allocation5 + $0x48] sm:$0xff]   ;;  %s737_s20 = sshll.u32 %s1272_s25, 6  ;;  %s768_s8 = sshll.u32 %s1087_s15, 10 }
  0x5c   : > { %v928_v1 = vld [vmem:[#allocation5] sm:$0xff]   ;;  %769 = vmatprep.subr.bf16.mxu0 %v927_v0  ;;  %v931_v4 = vld [vmem:[#allocation5 + $0x8] sm:$0xff]   ;;  %v933_v6 = vld [vmem:[#allocation5 + $0x50] sm:$0xff]   ;;  %s1296_s7 = scalar_lea.vmem [#allocation7], %s737_s20  ;;  %s1309_s6 = scalar_lea.hbm %s1365_s3, %s768_s8 }
  0x5d   : > { %v929_v2 = vld [vmem:[#allocation5 + $0x80] sm:$0xff]   ;;  %770 = vmatpush3.bf16.msra.mxu0 %v928_v1  ;;  %v932_v5 = vld [vmem:[#allocation5 + $0x88] sm:$0xff]   ;;  %v934_v7 = vld [vmem:[#allocation5 + $0x10] sm:$0xff]   ;;  %s631_s10 = sshll.u32 %s1296_s7, 4  ;;  %s618_s9 = scalar_lea.sflag [#allocation4], %s1272_s25  ;;  %s1311_s10 = int_to_ptr.vmem [resolvable:$true] %s631_s10 }
  0x5e   : > { %821 = vmatprep.subr.bf16.mxu1 %v929_v2  ;;  %771 = vmatprep.subr.bf16.mxu0 %v930_v3  ;;  %v935_v8 = vld [vmem:[#allocation5 + $0x90] sm:$0xff]   ;;  %v936_v9 = vld [vmem:[#allocation5 + $0x58] sm:$0xff]   ;;  %v939_v12 = vld [vmem:[#allocation5 + $0x60] sm:$0xff]   ;;  %s1009_s21 = scalar_lea.vmem %s1311_s10, 1024  ;;  %s1103_s15 = smov [#allocation7]  }
  0x5f   : > { %822 = vmatpush3.bf16.msra.mxu1 %v929_v2  ;;  %v937_v10 = vld [vmem:[#allocation5 + $0x18] sm:$0xff]   ;;  %v941_v13 = vld [vmem:[#allocation5 + $0xa0] sm:$0xff]   ;;  %v942_v15 = vld [vmem:[#allocation5 + $0x68] sm:$0xff]   ;;  %p1010_p4 = scmp.ne.s32.totalorder %s1311_s10, %s1009_s21  ;;  %s1013_s18 = sshll.u32 %s1103_s15, 4  ;;  %s1014_s18 = int_to_ptr.vmem [resolvable:$false] %s1013_s18 }
  0x60   : > { %823 = vmatprep.subr.bf16.mxu1 %v932_v5  ;;  %v938_v11 = vld [vmem:[#allocation5 + $0x98] sm:$0xff]   ;;  %v940_v14 = vld [vmem:[#allocation5 + $0x20] sm:$0xff]   ;;  %v944_v16 = vld [vmem:[#allocation5 + $0xa8] sm:$0xff]   ;;  %s1015_s19 = scalar_lea.vmem %s1014_s18, 2048  ;;  %p1016_p12 = scmp.lt.s32.totalorder %s1311_s10, %s1014_s18 }
  0x61   : > { %772 = vmatpush3.bf16.msra.mxu0 %v931_v4  ;;  %v943_v17 = vld [vmem:[#allocation5 + $0x28] sm:$0xff]   ;;  %v945_v18 = vld [vmem:[#allocation5 + $0x70] sm:$0xff]   ;;  %v948_v21 = vld [vmem:[#allocation5 + $0x78] sm:$0xff]   ;;  %p1011_p6 = pnand %p1010_p4, %p1218_p10  ;;  %p1017_p13 = scmp.lt.s32.totalorder %s1015_s19, %s1009_s21 }
  0x62   : > { %773 = vmatprep.subr.bf16.mxu0 %v933_v6  ;;  %v947_v19 = vld [vmem:[#allocation5 + $0xb0] sm:$0xff]   ;;  %v254_v22 = vld [vmem:[%s1276_s26 + $0x8] sm:$0xff]  ;;  %v256_v38 = vld [vmem:[%s1276_s26 + $0x18] sm:$0xff] }
  0x63   : > { %824 = vmatpush3.bf16.msra.mxu1 %v932_v5  ;;  %v946_v20 = vld [vmem:[#allocation5 + $0x30] sm:$0xff]   ;;  %v260_v24 = vunpack.c.l.s8.bf16 %v254_v22  ;;  %v950_v26 = vld [vmem:[#allocation5 + $0xb8] sm:$0xff]   ;;  %v263_v31 = vunpack.c.h.s8.bf16 %v254_v22  ;;  %v265_v39 = vunpack.c.l.s8.bf16 %v256_v38  ;;  %v268_v41 = vunpack.c.h.s8.bf16 %v256_v38  ;;  %v738_v48 = vld [vmem:[%s1364_s2] ss:$0 sm:$0xff]  ;;  %p1012_p8 = pneg %p1011_p6  ;;  %p1018_p0 = por %p1017_p13, %p1016_p12 }
  0x64   : > { %825 = vmatprep.subr.bf16.mxu1 %v935_v8  ;;  %v255_v23 = vld [vmem:[%s1276_s26 + $0x10] sm:$0xff]  ;;  %v949_v27 = vld [vmem:[#allocation5 + $0x38] sm:$0xff]   ;;  %v253_v28 = vld [vmem:[%s1276_s26] sm:$0xff] }
  0x65   : > { %774 = vmatpush3.bf16.msra.mxu0 %v934_v7  ;;  %v261_v25 = vunpack.c.l.s8.bf16 %v255_v23  ;;  %503 = vmatprep.mubr.bf16.mxu0 %v260_v24  ;;  %v259_v29 = vunpack.c.l.s8.bf16 %v253_v28  ;;  %v258_v30 = vld [vmem:[%s1276_s26 + $0x28] sm:$0xff]  ;;  %v264_v32 = vunpack.c.h.s8.bf16 %v255_v23  ;;  %v257_v34 = vld [vmem:[%s1276_s26 + $0x20] sm:$0xff]  ;;  %v262_v35 = vunpack.c.h.s8.bf16 %v253_v28  ;;  %p1019_p5 = pnand %p1018_p0, %p1012_p8 }
  0x66   : > { %775 = vmatprep.subr.bf16.mxu0 %v936_v9  ;;  %v267_v33 = vunpack.c.l.s8.bf16 %v258_v30  ;;  %v266_v36 = vunpack.c.l.s8.bf16 %v257_v34  ;;  %v270_v37 = vunpack.c.h.s8.bf16 %v258_v30  ;;  %v269_v40 = vunpack.c.h.s8.bf16 %v257_v34 }
  0x67   : > { %826 = vmatpush3.bf16.msra.mxu1 %v935_v8  ;;  %837 = vmatprep.mubr.bf16.mxu1 %v261_v25 }
  0x68   : > { %827 = vmatprep.subr.bf16.mxu1 %v938_v11 }
  0x69   : > { %776 = vmatpush3.bf16.msra.mxu0 %v937_v10 }
  0x6a   : > { %777 = vmatprep.subr.bf16.mxu0 %v939_v12 }
  0x6b   : > { %828 = vmatpush3.bf16.msra.mxu1 %v938_v11 }
  0x6c   : > { %829 = vmatprep.subr.bf16.mxu1 %v941_v13 }
  0x6d   : > { %778 = vmatpush3.bf16.msra.mxu0 %v940_v14 }
  0x6e   : > { %779 = vmatprep.subr.bf16.mxu0 %v942_v15 }
  0x6f   : > { %830 = vmatpush3.bf16.msra.mxu1 %v941_v13 }
  0x70   : > { %831 = vmatprep.subr.bf16.mxu1 %v944_v16 }
  0x71   : > { %780 = vmatpush3.bf16.msra.mxu0 %v943_v17 }
  0x72   : > { %781 = vmatprep.subr.bf16.mxu0 %v945_v18 }
  0x73   : > { %832 = vmatpush3.bf16.msra.mxu1 %v944_v16 }
  0x74   : > { %833 = vmatprep.subr.bf16.mxu1 %v947_v19 }
  0x75   : > { %782 = vmatpush3.bf16.msra.mxu0 %v946_v20 }
  0x76   : > { %783 = vmatprep.subr.bf16.mxu0 %v948_v21 }
  0x77   : > { %834 = vmatpush3.bf16.msra.mxu1 %v947_v19 }
  0x78   : > { %835 = vmatprep.subr.bf16.mxu1 %v950_v26 }
  0x79   : > { %784 = vmatpush3.bf16.msra.mxu0 %v949_v27 }
  0x7b   : > { %836 = vmatpush3.bf16.msra.mxu1 %v950_v26 }
  0x7c   : > { %504 = vmatmul.mubr.bf16.vlgmr.msra.gmra.mrb[0].mxu0 %v259_v29 }
  0x7d   : > { %511 = vmatprep.mubr.bf16.mxu0 %v263_v31 }
  0x7e   : > { %838 = vmatmul.mubr.bf16.vlgmr.msra.gmra.mrb[0].mxu1 %v264_v32 }
  0x7f   : > { %841 = vmatprep.mubr.bf16.mxu1 %v267_v33 }
  0x84   : > { %512 = vmatmul.mubr.bf16.gmra.mrb[4].mxu0 %v262_v35 }
  0x85   : > { %519 = vmatprep.mubr.bf16.mxu0 %v266_v36 }
  0x86   : > { %842 = vmatmul.mubr.bf16.gmra.mrb[4].mxu1 %v270_v37 }
  0x8c   : > { %520 = vmatmul.mubr.bf16.gmra.mrb[8].mxu0 %v265_v39 }
  0x8d   : > { %527 = vmatprep.mubr.bf16.mxu0 %v269_v40 }
  0x94   : > { %528 = vmatmul.mubr.bf16.gmra.mrb[12].mxu0 %v268_v41 }
 0x14f   : > { %v785_v42 = vpop.f32.mrb[0].mxu0 }
 0x150   : > { %v786_v43 = vpop.f32.mrb[1].mxu0 }
 0x151   : > { %v787_v44 = vadd.f32 %v786_v43, %v785_v42  ;;  %v788_v45 = vpop.f32.mrb[2].mxu0  ;;  %v839_v46 = vpop.f32.mrb[0].mxu1 }
 0x152   : > { %v789_v47 = vpop.f32.mrb[3].mxu0  ;;  %v570_v49 = vpop.f32.mrb[1].mxu1 }
 0x153   : > { %v790_v50 = vadd.f32 %v789_v47, %v788_v45  ;;  %v571_v51 = vadd.f32 %v787_v44, %v570_v49  ;;  %v840_v52 = vpop.f32.mrb[2].mxu1 }
 0x154   : > { %v573_v53 = vpop.f32.mrb[3].mxu1 }
 0x155   : > { %v601_v54 = vadd.f32 %v738_v48, %v571_v51  ;;  %v574_v55 = vadd.f32 %v790_v50, %v573_v53 }
 0x157   : > { %609 = vst [vmem:[%s1296_s7] sm:$0xff] %v601_v54  ;;  %v602_v56 = vadd.f32 %v738_v48, %v574_v55  ;;  %v791_v57 = vpop.f32.mrb[4].mxu0 }
 0x158   : > { %v792_v58 = vpop.f32.mrb[5].mxu0 }
 0x159   : > { %610 = vst [vmem:[%s1296_s7 + $0x8] sm:$0xff] %v602_v56  ;;  %v793_v59 = vadd.f32 %v792_v58, %v791_v57  ;;  %v794_v60 = vpop.f32.mrb[6].mxu0  ;;  %v843_v61 = vpop.f32.mrb[4].mxu1 }
 0x15a   : > { %v795_v62 = vpop.f32.mrb[7].mxu0  ;;  %v586_v63 = vpop.f32.mrb[5].mxu1 }
 0x15b   : > { %v579_v0 = vadd.f32 %v839_v46, %v793_v59  ;;  %v796_v1 = vadd.f32 %v795_v62, %v794_v60  ;;  %v844_v2 = vpop.f32.mrb[6].mxu1 }
 0x15c   : > { %v589_v3 = vpop.f32.mrb[7].mxu1 }
 0x15d   : > { %v603_v4 = vadd.f32 %v738_v48, %v579_v0  ;;  %v582_v5 = vadd.f32 %v840_v52, %v796_v1 }
 0x15f   : > { %611 = vst [vmem:[%s1296_s7 + $0x10] sm:$0xff] %v603_v4  ;;  %v604_v6 = vadd.f32 %v738_v48, %v582_v5  ;;  %v797_v7 = vpop.f32.mrb[8].mxu0 }
 0x160   : > { %v798_v8 = vpop.f32.mrb[9].mxu0 }
 0x161   : > { %612 = vst [vmem:[%s1296_s7 + $0x18] sm:$0xff] %v604_v6  ;;  %v799_v9 = vadd.f32 %v798_v8, %v797_v7  ;;  %v800_v10 = vpop.f32.mrb[10].mxu0 }
 0x162   : > { %v801_v11 = vpop.f32.mrb[11].mxu0 }
 0x163   : > { %v802_v12 = vadd.f32 %v801_v11, %v800_v10  ;;  %v587_v13 = vadd.f32 %v799_v9, %v586_v63 }
 0x165   : > { %v605_v14 = vadd.f32 %v738_v48, %v587_v13  ;;  %v590_v15 = vadd.f32 %v802_v12, %v589_v3 }
 0x167   : > { %613 = vst [vmem:[%s1296_s7 + $0x20] sm:$0xff] %v605_v14  ;;  %v606_v16 = vadd.f32 %v738_v48, %v590_v15  ;;  %v803_v17 = vpop.f32.mrb[12].mxu0 }
 0x168   : > { %v804_v18 = vpop.f32.mrb[13].mxu0 }
 0x169   : > { %614 = vst [vmem:[%s1296_s7 + $0x28] sm:$0xff] %v606_v16  ;;  %v805_v19 = vadd.f32 %v804_v18, %v803_v17  ;;  %v806_v20 = vpop.f32.mrb[14].mxu0 }
 0x16a   : > { %v807_v21 = vpop.f32.mrb[15].mxu0 }
 0x16b   : > { %v595_v22 = vadd.f32 %v843_v61, %v805_v19  ;;  %v808_v23 = vadd.f32 %v807_v21, %v806_v20 }
 0x16d   : > { %v607_v24 = vadd.f32 %v738_v48, %v595_v22  ;;  %v598_v25 = vadd.f32 %v844_v2, %v808_v23 }
 0x16f   : > { %615 = vst [vmem:[%s1296_s7 + $0x30] sm:$0xff] %v607_v24  ;;  %v608_v26 = vadd.f32 %v738_v48, %v598_v25 }
 0x171   : > { %616 = vst [vmem:[%s1296_s7 + $0x38] sm:$0xff] %v608_v26 }
 0x172   : > { %1022 = shalt.err (!%p1019_p5)
}
 0x173   : > { %s1023_s30 = scalar_lea.hbm %s1309_s6, 1024  ;;  %s1027_s20 = scalar_lea.hbm %s1365_s3, 2048 }
 0x174   : > { %p1024_p9 = scmp.ne.s32.totalorder %s1309_s6, %s1023_s30  ;;  %p1028_p3 = scmp.lt.u32.totalorder %s1309_s6, %s1365_s3 }
 0x175   : > { %p1029_p7 = scmp.lt.u32.totalorder %s1027_s20, %s1023_s30  ;;  %p1031_p4 = scmp.lt.u32.totalorder %s1023_s30, %s1309_s6 }
 0x176   : > { %p1025_p1 = pnand %p1024_p9, %p1218_p10 }
 0x177   : > { %p1030_p11 = por %p1029_p7, %p1028_p3 }
 0x178   : > { %p1026_p2 = pneg %p1025_p1 }
 0x179   : > { %p1032_p6 = por %p1031_p4, %p1030_p11 }
 0x17b   : > { %p1033_p8 = pnand %p1032_p6, %p1026_p2 }
 0x17d   : > { %1036 = shalt.err (!%p1033_p8)
}
 0x17e   : > { %s1104_s7 = smov 128   ;;  %s1105_s8 = smov 8  }
 0x17f   : > { %854 = dma.vmem_to_hbm [thread:$0]  (%p1218_p10), %s1311_s10, 1024, %s1309_s6, %s618_s9, %s1104_s7, %s1104_s7, %s1105_s8  }
 0x180 PF: > { %s646_s11 = sand.u32 1, %s1075_s12   ;;  %p1382_p12 = scmp.ne.s32.totalorder %s1373_s23, 0 }
 0x181   : > { %p1383_p13 = scmp.ge.s32.totalorder %s1095_s17, 2  ;;  %s647_s27 = scalar_lea.sflag [#allocation4], %s646_s11 }
 0x183   : > { %p865_p0 = pnand %p1383_p13, %p1382_p12 }
 0x185   : > { %1070 = dma.done.wait (!%p865_p0), %s647_s27, 1024  }
 0x186   : > { %1072 = vsyncadd (!%p865_p0), %s647_s27, 4294966272  ;;  %s20_s17 = sadd.s32 1, %s1095_s17   ;;  %s1384_s12 = smov %s1079_s13 }
 0x187   : > { %p17_p5 = scmp.ge.s32.totalorder %s20_s17, 4   ;;  %s1385_s13 = smov %s1083_s14 }
 0x188   : > { %s1386_s14 = smov %s1227_s5  ;;  %s1387_s15 = smov %s1091_s16 }
 0x189   : > { %s1388_s16 = smov %s1390_s28  ;;  %19 = sbr.rel (!%p17_p5) target bundleno = 7 (0x7), region = 86 }
 0x190   :  { %652 = vsyncpa [#allocation3], 1 }
 0x191   :  { %654 = vsyncpa [#allocation3 + $0x1], 1 }
 0x192   :  { %655 = vsyncpa [#allocation6], 1 }
 0x193   :  { %656 = vsyncpa [#allocation4], 1 }
 0x194   :  { %658 = vsyncpa [#allocation4 + $0x1], 1 }

</bundles_post_ra>
